<compile_context>
chip_gen: v5e
topology: v5e:2x2
jax: 0.10.0
libtpu: 0.0.40
codegen_flags: <defaults>
</compile_context>

<pallas_src>
import math

import jax
import jax.numpy as jnp
import numpy as np
from jax.experimental import pallas as pl
from jax.experimental.pallas import tpu as pltpu

MAX_LEN = 5000          # module default max_len (persistent `pe` buffer length)
D_MODEL = 128           # hidden size; multiple of 128 -> lane-dense, unmasked vst
SEQ_LEN = 256           # demo sequence length
DEFAULT_TILE_S = 2048   # rows per grid step (tunable; ~1 MiB per stream at D=128 f32)
_VMEM_BUDGET = 40 * 1024 * 1024   # cap for the double-buffered working set (v7x: 64 MiB/TC)


def make_sinusoidal_pe(max_len: int, d_model: int, dtype=jnp.float32) -> jnp.ndarray:
    """Host-side construction of the persistent `pe` buffer (mirrors __init__ /
    register_buffer): pe[:, 0::2] = sin(pos*div), pe[:, 1::2] = cos(pos*div)."""
    position = jnp.arange(max_len, dtype=jnp.float32)[:, None]
    div_term = jnp.exp(jnp.arange(0, d_model, 2, dtype=jnp.float32)
                       * (-math.log(10000.0) / d_model))
    angles = position * div_term                        # (max_len, d_model // 2)
    pe = jnp.zeros((max_len, d_model), jnp.float32)
    pe = pe.at[:, 0::2].set(jnp.sin(angles))
    pe = pe.at[:, 1::2].set(jnp.cos(angles))
    return pe.astype(dtype)


def _pos_enc_kernel(x_ref, pe_ref, o_ref):
    # forward: x + pe[:x.size(0)] -> one fused VPU add per lane-dense tile.
    # Explicit casts keep mixed-precision inputs from silently promoting on the store.
    o_ref[...] = (x_ref[...] + pe_ref[...].astype(x_ref.dtype)).astype(o_ref.dtype)


def _round_up(v: int, m: int) -> int:
    return (v + m - 1) // m * m


def positional_encoding(x: jnp.ndarray, pe: jnp.ndarray, *,
                        tile_s: int = DEFAULT_TILE_S,
                        min_grid: int = 2,
                        donate_x: bool = False) -> jnp.ndarray:
    """Pallas TPU implementation of PositionalEncoding.forward: x + pe[:S]."""
    S, D = x.shape
    max_len, d_pe = pe.shape
    assert d_pe == D and S <= max_len

    # Cast the table once to the activation dtype: for bf16 activations this halves
    # the pe read bytes of an otherwise HBM-bound kernel (no-op when already f32).
    pe = pe.astype(x.dtype)

    itemsize = np.dtype(x.dtype).itemsize
    sublane = 8 * max(1, 4 // itemsize)        # 8 (f32) / 16 (bf16) / 32 (int8) rows
    # Cap the tile so (x, pe, out) x 2 pipeline buffers stays under the VMEM budget.
    max_tile_vmem = max(sublane, (_VMEM_BUDGET // (6 * D * itemsize)) // sublane * sublane)
    # Keep at least `min_grid` sequence tiles so both v7x TensorCores stream.
    max_tile_grid = _round_up(pl.cdiv(S, min_grid), sublane)
    eff_tile = max(sublane, min(tile_s, max_tile_vmem, max_tile_grid))

    grid = (pl.cdiv(S, eff_tile),)             # ragged S -> partial (masked) last tile
    working_set = 6 * eff_tile * D * itemsize
    vmem_limit = int(min(48 * 1024 * 1024, max(16 * 1024 * 1024, 2 * working_set)))

    return pl.pallas_call(
        _pos_enc_kernel,
        out_shape=jax.ShapeDtypeStruct((S, D), x.dtype),
        grid_spec=pltpu.PrefetchScalarGridSpec(
            num_scalar_prefetch=0,
            grid=grid,
            # The pe BlockSpec windows the (max_len, D) buffer, so only the first
            # ~S rows are ever DMA'd (no host-side slice / extra HBM copy).
            in_specs=[pl.BlockSpec((eff_tile, D), lambda i: (i, 0)),   # x tile
                      pl.BlockSpec((eff_tile, D), lambda i: (i, 0))],  # pe rows
            out_specs=pl.BlockSpec((eff_tile, D), lambda i: (i, 0)),
        ),
        compiler_params=pltpu.CompilerParams(
            dimension_semantics=("parallel",),   # independent seq tiles -> megacore
            vmem_limit_bytes=vmem_limit),
        # Optionally write the result back into x's HBM buffer (caller must donate x).
        input_output_aliases=({0: 0} if donate_x else {}),
    )(x, pe)


if __name__ == "__main__":
    pe_f32 = make_sinusoidal_pe(MAX_LEN, D_MODEL)

    # 1) f32, S divisible by the tile choice
    x = jax.random.normal(jax.random.PRNGKey(0), (SEQ_LEN, D_MODEL), jnp.float32)
    out = jax.block_until_ready(positional_encoding(x, pe_f32))
    ref = x + pe_f32[:SEQ_LEN]
    np.testing.assert_allclose(np.asarray(out), np.asarray(ref), rtol=1e-6, atol=1e-6)

    # 2) f32, ragged S (exercises the pl.cdiv grid + masked boundary stores)
    s2 = 200
    x2 = jax.random.normal(jax.random.PRNGKey(1), (s2, D_MODEL), jnp.float32)
    out2 = jax.block_until_ready(positional_encoding(x2, pe_f32))
    ref2 = x2 + pe_f32[:s2]
    np.testing.assert_allclose(np.asarray(out2), np.asarray(ref2), rtol=1e-6, atol=1e-6)

    # 3) bf16 activations (exercises the host-side pe cast + explicit store cast)
    x3 = jax.random.normal(jax.random.PRNGKey(2), (SEQ_LEN, D_MODEL), jnp.bfloat16)
    out3 = jax.block_until_ready(positional_encoding(x3, pe_f32))
    ref3 = x3 + pe_f32[:SEQ_LEN].astype(jnp.bfloat16)
    np.testing.assert_allclose(np.asarray(out3.astype(jnp.float32)),
                               np.asarray(ref3.astype(jnp.float32)),
                               rtol=2e-2, atol=6e-2)

    print("KERNEL_OK")
</pallas_src>

<mosaic_0001>
module attributes {stable_mosaic.version = 11 : i64} {
  func.func @_pos_enc_kernel(%arg0: i32, %arg1: memref<128x128xf32, #tpu.memory_space<vmem>>, %arg2: memref<128x128xf32, #tpu.memory_space<vmem>>, %arg3: memref<128x128xf32, #tpu.memory_space<vmem>>) attributes {dimension_semantics = [#tpu.dimension_semantics<parallel>], iteration_bounds = array<i64: 2>, scalar_prefetch = 0 : i64, scratch_operands = 0 : i64, tpu.core_type = #tpu.core_type<tc>, window_params = [{transform_indices = @transform_0, window_bounds = array<i64: 128, 128>}, {transform_indices = @transform_1, window_bounds = array<i64: 128, 128>}, {transform_indices = @transform_2, window_bounds = array<i64: 128, 128>}]} {
    %c0 = arith.constant 0 : index
    %c0_0 = arith.constant 0 : index
    %0 = vector.load %arg1[%c0, %c0_0] : memref<128x128xf32, #tpu.memory_space<vmem>>, vector<128x128xf32>
    %c0_1 = arith.constant 0 : index
    %c0_2 = arith.constant 0 : index
    %1 = vector.load %arg2[%c0_1, %c0_2] : memref<128x128xf32, #tpu.memory_space<vmem>>, vector<128x128xf32>
    %2 = arith.addf %0, %1 : vector<128x128xf32>
    %c0_3 = arith.constant 0 : index
    %c0_4 = arith.constant 0 : index
    %3 = vector.load %arg3[%c0_3, %c0_4] : memref<128x128xf32, #tpu.memory_space<vmem>>, vector<128x128xf32>
    tpu.vector_store %arg3[%c0_3, %c0_4], %2 {strides = array<i32>} : memref<128x128xf32, #tpu.memory_space<vmem>>, vector<128x128xf32>,
    return
  }
  func.func @transform_0(%arg0: i32) -> (i32, i32) {
    %c0_i32 = arith.constant 0 : i32
    %c0_i32_0 = arith.constant 0 : i32
    return %arg0, %c0_i32 : i32, i32
  }
  func.func @transform_1(%arg0: i32) -> (i32, i32) {
    %c0_i32 = arith.constant 0 : i32
    %c0_i32_0 = arith.constant 0 : i32
    return %arg0, %c0_i32 : i32, i32
  }
  func.func @transform_2(%arg0: i32) -> (i32, i32) {
    %c0_i32 = arith.constant 0 : i32
    %c0_i32_0 = arith.constant 0 : i32
    return %arg0, %c0_i32 : i32, i32
  }
}

</mosaic_0001>

<bundles_post_ra>
// kernel: tpu_custom_call.1
= control target key start
LH: loop header
LB: loop body
LE: loop exit
PB: predicated region body
PF: predicated region fallthrough
CT: control target
= control target key end

     0   :  { %7 = vsyncpa [#allocation3], 0  ;;  %s863_s0 = inlined_call_operand.hbm [shape: f32[256,128], index: 0, kind: input, shape index: {}]   ;;  %s864_s1 = inlined_call_operand.hbm [shape: f32[5000,128], index: 1, kind: input, shape index: {}]   ;;  %s865_s2 = inlined_call_operand.hbm [shape: f32[256,128], index: 2, kind: output, shape index: {}]  }
   0x1   :  { %9 = vsyncpa [#allocation3 + $0x1], 0 }
   0x2   :  { %10 = vsyncpa [#allocation6], 0 }
   0x3   :  { %12 = vsyncpa [#allocation6 + $0x1], 0 }
   0x4   :  { %13 = vsyncpa [#allocation4], 0 }
   0x5   :  { %15 = vsyncpa [#allocation4 + $0x1], 0  ;;  %s630_s9 = smov 0   ;;  %s632_s10 = smov 0  }
   0x6   :  { %s634_s11 = smov 0   ;;  %s636_s12 = smov 0  }
   0x7 LB: > { %s651_s13 = sadd.s32 4294967295, %s606_s12   ;;  %s396_s14 = sadd.s32 4294967294, %s606_s12   ;;  %s606_s12 = sphi %s636_s12, %s876_s12   ;;  %s602_s11 = sphi %s634_s11, %s875_s11   ;;  %s598_s10 = sphi %s632_s10, %s874_s10   ;;  %s594_s9 = sphi %s630_s9, %s873_s9  }
   0x8   : > { %s655_s15 = sadd.s32 1, %s606_s12   ;;  %s28_s16 = sadd.s32 1, %s602_s11 }
   0x9   : > { %s25_s17 = ssub.s32 %s606_s12, %s655_s15  ;;  %p35_p0 = scmp.ne.s32.totalorder %s602_s11, %s598_s10 }
   0xa   : > { %p26_p1 = scmp.eq.s32.totalorder %s25_s17, 0  ;;  %p36_p2 = scmp.eq.s32.totalorder %s606_s12, 0 }
   0xb   : > { %p41_p3 = scmp.ne.s32.totalorder %s598_s10, %s594_s9  ;;  %p42_p4 = scmp.eq.s32.totalorder %s651_s13, 0 }
   0xc   : > { %s667_s18 = scalar_select %p26_p1, %s602_s11, %s28_s16  }
   0xd   : > { %p669_p5 = por %p36_p2, %p35_p0  ;;  %p673_p6 = por %p42_p4, %p41_p3 }
   0xe   : > { %p91_p7 = scmp.eq.s32.totalorder %s651_s13, 1  ;;  %p97_p8 = scmp.eq.s32.totalorder %s396_s14, 1 }
   0xf   : > { %p866_p11 = scmp.ge.s32.totalorder %s606_s12, 2 }
  0x10   : > { %p678_p9 = por %p91_p7, %p35_p0  ;;  %p682_p10 = por %p97_p8, %p41_p3 }
  0x11   : > { %113 = sbr.rel (%p866_p11) target bundleno = 70 (0x46), region = 16  ;;  %s690_s23 = sand.u32 (!%p866_p11), 1, %s602_s11  }
  0x12   : > { %s418_s24 = sshll.u32 (!%p866_p11), %s606_s12, 7  ;;  %s399_s25 = sshll.u32 (!%p866_p11), %s690_s23, 7 }
  0x13   : > { %s126_s28 = scalar_lea.hbm (!%p866_p11), %s863_s0, %s418_s24  ;;  %s121_s30 = scalar_lea.vmem (!%p866_p11), [#allocation2], %s399_s25 }
  0x14   : > { %s127_s29 = sshll.u32 (!%p866_p11), %s126_s28, 4  ;;  %s129_s3 = sshll.u32 (!%p866_p11), %s121_s30, 4  ;;  %s128_s29 = int_to_ptr.hbm [resolvable:$true] %s127_s29  ;;  %s130_s3 = int_to_ptr.vmem [resolvable:$true] %s129_s3 }
  0x15   : > { %s118_s4 = scalar_lea.sflag (!%p866_p11), [#allocation3], %s690_s23  ;;  %s469_s5 = sshra.s32 (!%p866_p11), %s128_s29, 4  ;;  %s470_s5 = int_to_ptr.hbm [resolvable:$true] %s469_s5 }
  0x16   : > { %s471_s6 = scalar_lea.hbm %s470_s5, 128  ;;  %s475_s14 = scalar_lea.hbm %s863_s0, 256 }
  0x17   : > { %p472_p12 = scmp.ne.s32.totalorder %s470_s5, %s471_s6  ;;  %p476_p1 = scmp.lt.s32.totalorder %s470_s5, %s863_s0 }
  0x18   : > { %p477_p2 = scmp.lt.s32.totalorder %s475_s14, %s471_s6 }
  0x19   : > { %p473_p13 = pnand %p472_p12, %p669_p5 }
  0x1a   : > { %p478_p3 = por %p477_p2, %p476_p1 }
  0x1b   : > { %p474_p0 = pneg %p473_p13 }
  0x1d   : > { %p479_p4 = pnand %p478_p3, %p474_p0 }
  0x1f   : > { %482 = shalt.err (!%p479_p4)
}
  0x20   : > { %s608_s26 = smov 128   ;;  %s609_s27 = smov 8  }
  0x21   : > { %421 = dma.hbm_to_vmem [thread:$0]  (%p669_p5), %s128_s29, 2048, %s130_s3, %s118_s4, %s608_s26, %s608_s26, %s609_s27  }
  0x22   : > { %138 = sbr.rel (!%p669_p5) target bundleno = 70 (0x46), region = 24  ;;  %s403_s28 = sshll.u32 (%p669_p5), %s606_s12, 4 }
  0x23   : > { %s145_s30 = ssub.s32 (%p669_p5), 625, %s403_s28  ;;  %s140_s8 = scalar_lea.sflag (%p669_p5), [#allocation6], %s690_s23 }
  0x24   : > { %p146_p7 = scmp.lt.s32.totalorder (%p669_p5), %s145_s30, 16  ;;  %s143_s14 = scalar_lea.vmem (%p669_p5), [#allocation5], %s399_s25 }
  0x27   : > { %s878_s30 = smov (!%p146_p7, %s145_s30), 16 }
  0x28   : > { %s404_s5 = sshll.u32 %s878_s30, 3 }
  0x29   : > { %s149_s6 = ssub.s32 128, %s404_s5 }
  0x2a   : > { %s150_s7 = sshll.u32 %s149_s6, 4 }
  0x2b   : > { %151 = vsyncadd %s140_s8, %s150_s7  ;;  %p723_p5 = scmp.ne.s32.totalorder %s404_s5, 0  ;;  %s154_s4 = scalar_lea.hbm %s864_s1, %s418_s24 }
  0x2c   : > { %s156_s16 = sshll.u32 %s154_s4, 4  ;;  %s158_s17 = sshll.u32 %s143_s14, 4  ;;  %s732_s16 = int_to_ptr.hbm [resolvable:$true] %s156_s16  ;;  %s734_s17 = int_to_ptr.vmem [resolvable:$true] %s158_s17 }
  0x2d   : > { %s408_s25 = sshll.u32 %s878_s30, 7  ;;  %s497_s26 = sshra.s32 %s732_s16, 4  ;;  %s498_s26 = int_to_ptr.hbm [resolvable:$true] %s497_s26 }
  0x2e   : > { %s499_s27 = sshrl.u32 %s408_s25, 4  ;;  %s508_s24 = scalar_lea.hbm %s864_s1, 5000 }
  0x2f   : > { %s504_s28 = scalar_lea.hbm %s498_s26, %s499_s27  ;;  %p509_p0 = scmp.lt.s32.totalorder %s498_s26, %s864_s1 }
  0x30   : > { %p505_p8 = scmp.ne.s32.totalorder %s498_s26, %s504_s28  ;;  %p510_p1 = scmp.lt.s32.totalorder %s508_s24, %s504_s28 }
  0x32   : > { %p506_p12 = pnand %p505_p8, %p723_p5  ;;  %p511_p2 = por %p510_p1, %p509_p0 }
  0x34   : > { %p507_p13 = pneg %p506_p12 }
  0x36   : > { %p512_p3 = pnand %p511_p2, %p507_p13 }
  0x38   : > { %515 = shalt.err (!%p512_p3)
}
  0x39   : > { %s516_s29 = sshra.s32 %s734_s17, 4  ;;  %s610_s4 = smov [#allocation5]   ;;  %s517_s29 = int_to_ptr.vmem [resolvable:$true] %s516_s29 }
  0x3a   : > { %s523_s3 = scalar_lea.vmem %s517_s29, %s499_s27  ;;  %s527_s5 = scalar_lea.vmem %s610_s4, 256 }
  0x3b   : > { %p524_p4 = scmp.ne.s32.totalorder %s517_s29, %s523_s3  ;;  %p529_p12 = scmp.lt.s32.totalorder %s527_s5, %s523_s3 }
  0x3d   : > { %p525_p7 = pnand %p524_p4, %p723_p5 }
  0x3f   : > { %p526_p8 = pneg %p525_p7 }
  0x41   : > { %p531_p11 = pnand %p529_p12, %p526_p8 }
  0x43   : > { %534 = shalt.err (!%p531_p11)
}
  0x44   : > { %s611_s6 = smov 128   ;;  %s612_s26 = smov 8  }
  0x45   : > { %164 = dma.hbm_to_vmem [thread:$0]  (%p723_p5), %s732_s16, %s408_s25, %s734_s17, %s140_s8, %s611_s6, %s611_s6, %s612_s26  }
  0x46 PF: > { %p409_p13 = scmp.ge.s32.totalorder %s606_s12, 1  ;;  %p166_p0 = scmp.lt.s32.totalorder %s606_s12, 3 }
  0x48   : > { %p167_p1 = pnand %p409_p13, %p166_p0 }
  0x49   : > { %s762_s27 = sand.u32 (!%p167_p1), 1, %s598_s10  }
  0x4a   : > { %170 = sbr.rel (%p167_p1) target bundleno = 105 (0x69), region = 28  ;;  %s410_s28 = sshll.u32 (!%p167_p1), %s762_s27, 7 }
  0x4b   : > { %s173_s24 = scalar_lea.sflag (!%p167_p1), [#allocation3], %s762_s27  ;;  %s766_s19 = scalar_lea.vmem (!%p167_p1), [#allocation2], %s410_s28 }
  0x4f   : > { %581 = dma.done.wait (%p673_p6), %s173_s24, 2048  }
  0x50   : > { %583 = vsyncadd (%p673_p6), %s173_s24, 4294965248  ;;  %s183_s23 = scalar_lea.sflag [#allocation6], %s762_s27  ;;  %s773_s30 = scalar_lea.vmem [#allocation5], %s410_s28 }
  0x51   : > { %585 = dma.done.wait (%p673_p6), %s183_s23, 2048  }
  0x52   : > { %587 = vsyncadd (%p673_p6), %s183_s23, 4294965248  ;;  %v220_v0 = vld [vmem:[%s766_s19] sm:$0xff]  ;;  %v221_v2 = vld [vmem:[%s766_s19 + $0x8] sm:$0xff]  ;;  %s788_s20 = scalar_lea.vmem [#allocation7], %s410_s28  ;;  %s420_s8 = sshll.u32 %s651_s13, 7 }
  0x53   : > { %v236_v1 = vld [vmem:[%s773_s30] sm:$0xff]  ;;  %v237_v4 = vld [vmem:[%s773_s30 + $0x8] sm:$0xff]  ;;  %v222_v5 = vld [vmem:[%s766_s19 + $0x10] sm:$0xff]  ;;  %s296_s17 = scalar_lea.hbm %s865_s2, %s420_s8  ;;  %s297_s25 = sshll.u32 %s788_s20, 4  ;;  %s298_s25 = int_to_ptr.vmem [resolvable:$true] %s297_s25 }
  0x54   : > { %v252_v3 = vadd.f32 %v236_v1, %v220_v0  ;;  %v238_v6 = vld [vmem:[%s773_s30 + $0x10] sm:$0xff]  ;;  %v253_v7 = vadd.f32 %v237_v4, %v221_v2  ;;  %v223_v9 = vld [vmem:[%s766_s19 + $0x18] sm:$0xff]  ;;  %v224_v11 = vld [vmem:[%s766_s19 + $0x20] sm:$0xff]  ;;  %s299_s7 = sshll.u32 %s296_s17, 4  ;;  %s285_s14 = scalar_lea.sflag [#allocation4], %s762_s27  ;;  %s300_s7 = int_to_ptr.hbm [resolvable:$true] %s299_s7 }
  0x55   : > { %v254_v8 = vadd.f32 %v238_v6, %v222_v5  ;;  %v239_v10 = vld [vmem:[%s773_s30 + $0x18] sm:$0xff]  ;;  %v240_v13 = vld [vmem:[%s773_s30 + $0x20] sm:$0xff]  ;;  %v225_v14 = vld [vmem:[%s766_s19 + $0x28] sm:$0xff]  ;;  %s550_s29 = sshra.s32 %s300_s7, 4  ;;  %s556_s6 = scalar_lea.hbm %s865_s2, 256  ;;  %s551_s29 = int_to_ptr.hbm [resolvable:$true] %s550_s29 }
  0x56   : > { %268 = vst [vmem:[%s788_s20] sm:$0xff] %v252_v3  ;;  %v255_v12 = vadd.f32 %v239_v10, %v223_v9  ;;  %v241_v15 = vld [vmem:[%s773_s30 + $0x28] sm:$0xff]  ;;  %v256_v16 = vadd.f32 %v240_v13, %v224_v11  ;;  %v226_v18 = vld [vmem:[%s766_s19 + $0x30] sm:$0xff]  ;;  %v227_v20 = vld [vmem:[%s766_s19 + $0x38] sm:$0xff]  ;;  %s552_s3 = scalar_lea.hbm %s551_s29, 128  ;;  %p557_p2 = scmp.lt.s32.totalorder %s551_s29, %s865_s2 }
  0x57   : > { %269 = vst [vmem:[%s788_s20 + $0x8] sm:$0xff] %v253_v7  ;;  %v257_v17 = vadd.f32 %v241_v15, %v225_v14  ;;  %v242_v19 = vld [vmem:[%s773_s30 + $0x30] sm:$0xff]  ;;  %v243_v22 = vld [vmem:[%s773_s30 + $0x38] sm:$0xff]  ;;  %v228_v23 = vld [vmem:[%s766_s19 + $0x40] sm:$0xff]  ;;  %p553_p6 = scmp.ne.s32.totalorder %s551_s29, %s552_s3  ;;  %p558_p3 = scmp.lt.s32.totalorder %s556_s6, %s552_s3 }
  0x58   : > { %270 = vst [vmem:[%s788_s20 + $0x10] sm:$0xff] %v254_v8  ;;  %v258_v21 = vadd.f32 %v242_v19, %v226_v18  ;;  %v244_v24 = vld [vmem:[%s773_s30 + $0x40] sm:$0xff]  ;;  %v259_v25 = vadd.f32 %v243_v22, %v227_v20  ;;  %v229_v26 = vld [vmem:[%s766_s19 + $0x48] sm:$0xff]  ;;  %v230_v28 = vld [vmem:[%s766_s19 + $0x50] sm:$0xff] }
  0x59   : > { %271 = vst [vmem:[%s788_s20 + $0x18] sm:$0xff] %v255_v12  ;;  %v245_v27 = vld [vmem:[%s773_s30 + $0x48] sm:$0xff]  ;;  %v260_v29 = vadd.f32 %v244_v24, %v228_v23  ;;  %v246_v30 = vld [vmem:[%s773_s30 + $0x50] sm:$0xff]  ;;  %v231_v31 = vld [vmem:[%s766_s19 + $0x58] sm:$0xff]  ;;  %p554_p11 = pnand %p553_p6, %p678_p9  ;;  %p559_p4 = por %p558_p3, %p557_p2 }
  0x5a   : > { %272 = vst [vmem:[%s788_s20 + $0x20] sm:$0xff] %v256_v16  ;;  %v247_v32 = vld [vmem:[%s773_s30 + $0x58] sm:$0xff]  ;;  %v261_v33 = vadd.f32 %v245_v27, %v229_v26  ;;  %v232_v34 = vld [vmem:[%s766_s19 + $0x60] sm:$0xff]  ;;  %v262_v36 = vadd.f32 %v246_v30, %v230_v28  ;;  %v233_v37 = vld [vmem:[%s766_s19 + $0x68] sm:$0xff] }
  0x5b   : > { %273 = vst [vmem:[%s788_s20 + $0x28] sm:$0xff] %v257_v17  ;;  %v248_v35 = vld [vmem:[%s773_s30 + $0x60] sm:$0xff]  ;;  %v249_v38 = vld [vmem:[%s773_s30 + $0x68] sm:$0xff]  ;;  %v263_v39 = vadd.f32 %v247_v32, %v231_v31  ;;  %v234_v40 = vld [vmem:[%s766_s19 + $0x70] sm:$0xff]  ;;  %p555_p5 = pneg %p554_p11 }
  0x5c   : > { %274 = vst [vmem:[%s788_s20 + $0x30] sm:$0xff] %v258_v21  ;;  %v250_v41 = vld [vmem:[%s773_s30 + $0x70] sm:$0xff]  ;;  %v264_v42 = vadd.f32 %v248_v35, %v232_v34  ;;  %v235_v43 = vld [vmem:[%s766_s19 + $0x78] sm:$0xff]  ;;  %v265_v45 = vadd.f32 %v249_v38, %v233_v37 }
  0x5d   : > { %275 = vst [vmem:[%s788_s20 + $0x38] sm:$0xff] %v259_v25  ;;  %v251_v44 = vld [vmem:[%s773_s30 + $0x78] sm:$0xff]  ;;  %v266_v46 = vadd.f32 %v250_v41, %v234_v40  ;;  %p560_p7 = pnand %p559_p4, %p555_p5 }
  0x5e   : > { %276 = vst [vmem:[%s788_s20 + $0x40] sm:$0xff] %v260_v29  ;;  %v267_v47 = vadd.f32 %v251_v44, %v235_v43 }
  0x5f   : > { %277 = vst [vmem:[%s788_s20 + $0x48] sm:$0xff] %v261_v33 }
  0x60   : > { %278 = vst [vmem:[%s788_s20 + $0x50] sm:$0xff] %v262_v36 }
  0x61   : > { %279 = vst [vmem:[%s788_s20 + $0x58] sm:$0xff] %v263_v39 }
  0x62   : > { %280 = vst [vmem:[%s788_s20 + $0x60] sm:$0xff] %v264_v42 }
  0x63   : > { %281 = vst [vmem:[%s788_s20 + $0x68] sm:$0xff] %v265_v45 }
  0x64   : > { %282 = vst [vmem:[%s788_s20 + $0x70] sm:$0xff] %v266_v46 }
  0x65   : > { %283 = vst [vmem:[%s788_s20 + $0x78] sm:$0xff] %v267_v47 }
  0x66   : > { %563 = shalt.err (!%p560_p7)
}
  0x67   : > { %s613_s27 = smov 128   ;;  %s614_s24 = smov 8  }
  0x68   : > { %424 = dma.vmem_to_hbm [thread:$0]  (%p678_p9), %s298_s25, 2048, %s300_s7, %s285_s14, %s613_s27, %s613_s27, %s614_s24  }
  0x69 PF: > { %s314_s19 = sand.u32 1, %s594_s9   ;;  %p872_p8 = scmp.ge.s32.totalorder %s606_s12, 2 }
  0x6a   : > { %s315_s23 = scalar_lea.sflag [#allocation4], %s314_s19 }
  0x6b   : > { %p427_p12 = pnand %p872_p8, %p682_p10 }
  0x6d   : > { %p428_p13 = pneg %p427_p12 }
  0x6f   : > { %589 = dma.done.wait (%p428_p13), %s315_s23, 2048  }
  0x70   : > { %591 = vsyncadd (%p428_p13), %s315_s23, 4294965248  ;;  %p18_p0 = scmp.ge.s32.totalorder %s655_s15, 4   ;;  %s873_s9 = smov %s598_s10 }
  0x71   : > { %s874_s10 = smov %s602_s11  ;;  %s875_s11 = smov %s667_s18 }
  0x72   : > { %s876_s12 = smov %s655_s15  ;;  %20 = sbr.rel (!%p18_p0) target bundleno = 7 (0x7), region = 86 }
  0x77   :  { %321 = vsyncpa [#allocation3], 1 }
  0x78   :  { %323 = vsyncpa [#allocation3 + $0x1], 1 }
  0x79   :  { %324 = vsyncpa [#allocation6], 1 }
  0x7a   :  { %326 = vsyncpa [#allocation6 + $0x1], 1 }
  0x7b   :  { %327 = vsyncpa [#allocation4], 1 }
  0x7c   :  { %329 = vsyncpa [#allocation4 + $0x1], 1 }

</bundles_post_ra>
